<compile_context>
chip_gen: v6e
topology: v6e:2x2x1
jax: 0.10.0
libtpu: 0.0.40
codegen_flags: <defaults>
</compile_context>

<pallas_src>
import functools

import jax
import jax.numpy as jnp
from jax import lax
from jax.experimental import pallas as pl
from jax.experimental.pallas import tpu as pltpu


def _focal_loss_kernel(logits_ref, tgt_ref, alpha_ref, out_ref, *,
                       gamma, n_rows, tile_n):
    x = logits_ref[...].astype(jnp.float32)          # [T, C]
    tgt = tgt_ref[...]                               # [T, 1] int32
    alpha = alpha_ref[...]                           # [T, 1] f32

    t, c = x.shape

    # Numerically stable softmax pieces; exp(shifted) computed once, reused.
    row_max = jnp.max(x, axis=-1, keepdims=True)                     # [T, 1]
    shifted = x - row_max                                            # [T, C]
    exp_shifted = jnp.exp(shifted)                                   # [T, C]
    sum_exp = jnp.sum(exp_shifted, axis=-1, keepdims=True)           # [T, 1]

    # One-hot selection of the true class via masked reductions.
    col_ids = lax.broadcasted_iota(jnp.int32, (t, c), dimension=1)   # [T, C]
    onehot = col_ids == tgt                                          # [T, C] bool
    logit_t = jnp.sum(jnp.where(onehot, shifted, 0.0),
                      axis=-1, keepdims=True)                        # [T, 1]
    exp_t = jnp.sum(jnp.where(onehot, exp_shifted, 0.0),
                    axis=-1, keepdims=True)                          # [T, 1]

    ce = jnp.log(sum_exp) - logit_t                                  # [T, 1]
    pt = exp_t / sum_exp                                             # == exp(-ce)
    base = jnp.maximum(1.0 - pt, 0.0)                                # clamp fp slop

    # gamma is a Python float -> specialise at trace time.
    if gamma == 0.0:
        factor = jnp.ones_like(base)
    elif float(gamma).is_integer():
        factor = base
        for _ in range(int(gamma) - 1):
            factor = factor * base
    else:
        factor = jnp.power(base, gamma)

    focal = alpha * factor * ce                                      # [T, 1]

    # Mask rows past N in the last (ragged) tile.
    if n_rows % tile_n != 0:
        row_ids = (pl.program_id(0) * tile_n
                   + lax.broadcasted_iota(jnp.int32, (t, 1), dimension=0))
        focal = jnp.where(row_ids < n_rows, focal, 0.0)

    # Vreg-aligned, unmasked partial-sum store for this tile.
    out_ref[...] = jnp.full((1, 8, 128), jnp.sum(focal), dtype=jnp.float32)


def focal_loss(logits, target, weight, gamma=0.0, tile_n=None):
    """logits: [N, C] (f32/bf16), target: [N] int, weight: [C] -> scalar f32."""
    n, c = logits.shape
    target = target.astype(jnp.int32)
    # Cheap XLA gather in the wrapper instead of an [N, C] masked reduce in-kernel.
    alpha = weight.astype(jnp.float32)[target].reshape(n, 1)
    tgt2d = target.reshape(n, 1)

    itemsize = jnp.dtype(logits.dtype).itemsize
    sublane = {4: 8, 2: 16, 1: 32}.get(itemsize, 8)
    if tile_n is None:
        # ~1 MiB of logits per tile; cap rows so iotas/intermediates stay small
        # when C is tiny.
        tile_n = max(sublane, min(8192, (1 << 20) // max(c * itemsize, 1)))
    tile_n = max(sublane, (tile_n // sublane) * sublane)
    n_padded = ((n + sublane - 1) // sublane) * sublane
    tile_n = min(tile_n, n_padded)
    num_tiles = pl.cdiv(n, tile_n)

    kernel = functools.partial(_focal_loss_kernel, gamma=float(gamma),
                               n_rows=n, tile_n=tile_n)

    partials = pl.pallas_call(
        kernel,
        grid=(num_tiles,),
        out_shape=jax.ShapeDtypeStruct((num_tiles, 8, 128), jnp.float32),
        in_specs=[
            pl.BlockSpec((tile_n, c), lambda i: (i, 0)),
            pl.BlockSpec((tile_n, 1), lambda i: (i, 0)),
            pl.BlockSpec((tile_n, 1), lambda i: (i, 0)),
        ],
        out_specs=pl.BlockSpec((1, 8, 128), lambda i: (i, 0, 0)),
        compiler_params=pltpu.CompilerParams(
            dimension_semantics=("parallel",),
            vmem_limit_bytes=32 * 1024 * 1024),
    )(logits, tgt2d, alpha)

    # Tiny reduction over per-tile partial sums (num_tiles scalars).
    return jnp.sum(partials[:, 0, 0])


def focal_loss_ref(logits, target, weight, gamma=0.0):
    """Pure-JAX reference mirroring the PyTorch forward."""
    logits = logits.astype(jnp.float32)
    logp = jax.nn.log_softmax(logits, axis=-1)
    ce = -jnp.take_along_axis(logp, target[:, None].astype(jnp.int32), axis=-1)[:, 0]
    pt = jnp.exp(-ce)
    alpha = weight.astype(jnp.float32)[target]
    return jnp.sum(alpha * (1.0 - pt) ** gamma * ce)


if __name__ == "__main__":
    key = jax.random.PRNGKey(0)
    k1, k2, k3, k4 = jax.random.split(key, 4)

    # --- shape implied by the module: [N, C] logits + [N] labels -------------
    N, C = 8, 4
    gamma = 2.0
    weight = jnp.array([0.25, 0.5, 1.0, 2.0], dtype=jnp.float32)

    logits = jax.random.normal(k1, (N, C), dtype=jnp.float32)
    target = jax.random.randint(k2, (N,), 0, C, dtype=jnp.int32)

    loss = focal_loss(logits, target, weight, gamma=gamma)
    jax.block_until_ready(loss)
    ref = focal_loss_ref(logits, target, weight, gamma=gamma)
    assert jnp.allclose(loss, ref, rtol=1e-5, atol=1e-5), (loss, ref)

    # --- second check: multi-tile grid + ragged-N masking path ---------------
    N2 = 200
    logits2 = jax.random.normal(k3, (N2, C), dtype=jnp.float32)
    target2 = jax.random.randint(k4, (N2,), 0, C, dtype=jnp.int32)

    loss2 = focal_loss(logits2, target2, weight, gamma=gamma, tile_n=64)
    jax.block_until_ready(loss2)
    ref2 = focal_loss_ref(logits2, target2, weight, gamma=gamma)
    assert jnp.allclose(loss2, ref2, rtol=1e-5, atol=1e-4), (loss2, ref2)

    print("KERNEL_OK")
</pallas_src>

<mosaic_0001>
module attributes {stable_mosaic.version = 11 : i64} {
  func.func @_focal_loss_kernel(%arg0: i32, %arg1: memref<8x4xf32, #tpu.memory_space<vmem>>, %arg2: memref<8x1xi32, #tpu.memory_space<vmem>>, %arg3: memref<8x1xf32, #tpu.memory_space<vmem>>, %arg4: memref<1x8x128xf32, #tpu.memory_space<vmem>>) attributes {dimension_semantics = [#tpu.dimension_semantics<parallel>], iteration_bounds = array<i64: 1>, scalar_prefetch = 0 : i64, scratch_operands = 0 : i64, tpu.core_type = #tpu.core_type<tc>, window_params = [{transform_indices = @transform_0, window_bounds = array<i64: 8, 4>}, {transform_indices = @transform_1, window_bounds = array<i64: 8, 1>}, {transform_indices = @transform_2, window_bounds = array<i64: 8, 1>}, {transform_indices = @transform_3, window_bounds = array<i64: 1, 8, 128>}]} {
    %c0 = arith.constant 0 : index
    %c0_0 = arith.constant 0 : index
    %0 = vector.load %arg1[%c0, %c0_0] : memref<8x4xf32, #tpu.memory_space<vmem>>, vector<8x4xf32>
    %c0_1 = arith.constant 0 : index
    %c0_2 = arith.constant 0 : index
    %1 = vector.load %arg2[%c0_1, %c0_2] : memref<8x1xi32, #tpu.memory_space<vmem>>, vector<8x1xi32>
    %c0_3 = arith.constant 0 : index
    %c0_4 = arith.constant 0 : index
    %2 = vector.load %arg3[%c0_3, %c0_4] : memref<8x1xf32, #tpu.memory_space<vmem>>, vector<8x1xf32>
    %cst = arith.constant dense<0xFF800000> : vector<8xf32>
    %3 = vector.multi_reduction <maximumf>, %0, %cst [1] : vector<8x4xf32> to vector<8xf32>
    %4 = vector.shape_cast %3 : vector<8xf32> to vector<8x1xf32>
    %5 = vector.broadcast %4 : vector<8x1xf32> to vector<8x4xf32>
    %6 = arith.subf %0, %5 : vector<8x4xf32>
    %7 = math.exp %6 : vector<8x4xf32>
    %cst_5 = arith.constant dense<0.000000e+00> : vector<8xf32>
    %8 = vector.multi_reduction <add>, %7, %cst_5 [1] : vector<8x4xf32> to vector<8xf32>
    %9 = vector.shape_cast %8 : vector<8xf32> to vector<8x1xf32>
    %10 = tpu.iota {dimensions = array<i32: 1>} : vector<8x4xi32>
    %11 = vector.broadcast %1 : vector<8x1xi32> to vector<8x4xi32>
    %12 = arith.cmpi eq, %10, %11 : vector<8x4xi32>
    %cst_6 = arith.constant 0.000000e+00 : f32
    %13 = vector.broadcast %cst_6 : f32 to vector<8x4xf32>
    %14 = arith.select %12, %6, %13 : vector<8x4xi1>, vector<8x4xf32>
    %cst_7 = arith.constant dense<0.000000e+00> : vector<8xf32>
    %15 = vector.multi_reduction <add>, %14, %cst_7 [1] : vector<8x4xf32> to vector<8xf32>
    %16 = vector.shape_cast %15 : vector<8xf32> to vector<8x1xf32>
    %cst_8 = arith.constant 0.000000e+00 : f32
    %17 = vector.broadcast %cst_8 : f32 to vector<8x4xf32>
    %18 = arith.select %12, %7, %17 : vector<8x4xi1>, vector<8x4xf32>
    %cst_9 = arith.constant dense<0.000000e+00> : vector<8xf32>
    %19 = vector.multi_reduction <add>, %18, %cst_9 [1] : vector<8x4xf32> to vector<8xf32>
    %20 = vector.shape_cast %19 : vector<8xf32> to vector<8x1xf32>
    %21 = math.log %9 : vector<8x1xf32>
    %22 = arith.subf %21, %16 : vector<8x1xf32>
    %23 = arith.divf %20, %9 : vector<8x1xf32>
    %cst_10 = arith.constant 1.000000e+00 : f32
    %24 = vector.broadcast %cst_10 : f32 to vector<8x1xf32>
    %25 = arith.subf %24, %23 : vector<8x1xf32>
    %cst_11 = arith.constant 0.000000e+00 : f32
    %26 = vector.broadcast %cst_11 : f32 to vector<8x1xf32>
    %27 = arith.maximumf %25, %26 : vector<8x1xf32>
    %28 = arith.mulf %27, %27 : vector<8x1xf32>
    %29 = arith.mulf %2, %28 : vector<8x1xf32>
    %30 = arith.mulf %29, %22 : vector<8x1xf32>
    %31 = vector.shape_cast %30 : vector<8x1xf32> to vector<1x8x1xf32>
    %cst_12 = arith.constant dense<0.000000e+00> : vector<1xf32>
    %32 = vector.multi_reduction <add>, %31, %cst_12 [1, 2] : vector<1x8x1xf32> to vector<1xf32>
    %33 = vector.shape_cast %32 : vector<1xf32> to vector<1x1x1xf32>
    %34 = vector.extract %33[0, 0, 0] : f32 from vector<1x1x1xf32>
    %35 = vector.broadcast %34 : f32 to vector<1x8x128xf32>
    %c0_13 = arith.constant 0 : index
    %c0_14 = arith.constant 0 : index
    %c0_15 = arith.constant 0 : index
    %36 = vector.load %arg4[%c0_13, %c0_14, %c0_15] : memref<1x8x128xf32, #tpu.memory_space<vmem>>, vector<1x8x128xf32>
    tpu.vector_store %arg4[%c0_13, %c0_14, %c0_15], %35 {strides = array<i32>} : memref<1x8x128xf32, #tpu.memory_space<vmem>>, vector<1x8x128xf32>,
    return
  }
  func.func @transform_0(%arg0: i32) -> (i32, i32) {
    %c0_i32 = arith.constant 0 : i32
    %c0_i32_0 = arith.constant 0 : i32
    return %arg0, %c0_i32 : i32, i32
  }
  func.func @transform_1(%arg0: i32) -> (i32, i32) {
    %c0_i32 = arith.constant 0 : i32
    %c0_i32_0 = arith.constant 0 : i32
    return %arg0, %c0_i32 : i32, i32
  }
  func.func @transform_2(%arg0: i32) -> (i32, i32) {
    %c0_i32 = arith.constant 0 : i32
    %c0_i32_0 = arith.constant 0 : i32
    return %arg0, %c0_i32 : i32, i32
  }
  func.func @transform_3(%arg0: i32) -> (i32, i32, i32) {
    %c0_i32 = arith.constant 0 : i32
    %c0_i32_0 = arith.constant 0 : i32
    %c0_i32_1 = arith.constant 0 : i32
    return %arg0, %c0_i32, %c0_i32_0 : i32, i32, i32
  }
}

</mosaic_0001>

<bundles_post_ra>
// kernel: tpu_custom_call.1
= control target key start
LH: loop header
LB: loop body
LE: loop exit
PB: predicated region body
PF: predicated region fallthrough
CT: control target
= control target key end

     0   :  { %vm18_vm0 = vcmask 31744   ;;  %s150_s0 = inlined_call_operand.vmem [shape: f32[8,4], index: 0, kind: input, shape index: {}]   ;;  %s151_s1 = inlined_call_operand.vmem [shape: s32[8,1], index: 1, kind: input, shape index: {}]   ;;  %s152_s2 = inlined_call_operand.vmem [shape: f32[8,1], index: 2, kind: input, shape index: {}]   ;;  %s153_s3 = inlined_call_operand.hbm [shape: f32[1,8,128], index: 3, kind: output, shape index: {}]  }
   0x1   :  { %v15_v0 = vld [vmem:[%s150_s0] sm:$0xff] }
   0x2   :  { %8 = vsyncpa [#allocation3], 0  ;;  %v19_v1 = vsel %vm18_vm0, %v15_v0, -inf  ;;  %v112_v2 = vmov 0   ;;  %v16_v3 = vld [vmem:[%s151_s1] sm:$0xff]  ;;  %v28_v7 = vlaneseq  ;;  %vm52_vm2 = vcmask 7168  }
   0x3   :  { %83 = vset.pattern.permute.xlu0 %v112_v2  ;;  %v17_v24 = vld [vmem:[%s152_s2] sm:$0xff]  ;;  %s113_s16 = smov [#allocation2]  }
   0x4   :  { %20 = vmax.xlane.f32.xlu0 %v19_v1  ;;  %v29_v8 = vand.u32 127, %v28_v7  ;;  %s71_s17 = sshll.u32 %s113_s16, 4  ;;  %s72_s17 = int_to_ptr.vmem [resolvable:$true] %s71_s17 }
   0x5   :  { %s90_s2 = scalar_lea.vmem %s72_s17, 128  ;;  %p95_p1 = scmp.lt.s32.totalorder %s72_s17, %s72_s17 }
   0x6   :  { %p91_p0 = scmp.ne.s32.totalorder %s72_s17, %s90_s2  ;;  %p96_p2 = scmp.lt.s32.totalorder %s90_s2, %s90_s2 }
   0x8   :  { %p97_p3 = por %p96_p2, %p95_p1 }
   0xa   :  { %p98_p4 = pnand %p97_p3, %p91_p0 }
  0x1a   :  { %31 = vperm.xlu0 %83, %v16_v3  }
  0x8d   :  { %v21_v4 = vpop.xlane.xlu0 %20 }
  0x8e   :  { %v22_v5 = vsub.f32 %v15_v0, %v21_v4 }
  0x90   :  { %v23_v6 = vmul.f32 1.442695, %v22_v5 }
  0x92   :  { %84 = vpow2.f32 %v23_v6 }
  0x95   :  { %v32_v9 = vpop.permute.xlu0 %31 }
  0x96   :  { %vm33_vm1 = vcmp.eq.s32.totalorder %v29_v8, %v32_v9 }
  0x97   :  { %v34_v14 = vsel %vm33_vm1, %v22_v5, 0.0 }
  0x98   :  { %v35_v15 = vsel %vm18_vm0, %v34_v14, 0.0 }
  0x9f   :  { %v85_v10 = vpop.eup %84 }
  0xa0   :  { %v25_v11 = vsel %vm18_vm0, %v85_v10, 0.0  ;;  %v38_v12 = vsel %vm33_vm1, %v85_v10, 0.0 }
  0xa1   :  { %26 = vadd.xlane.f32.xlu1 %v25_v11  ;;  %v39_v13 = vsel %vm18_vm0, %v38_v12, 0.0 }
  0xa5   :  { %40 = vadd.xlane.f32.xlu1 %v39_v13 }
  0xa9   :  { %36 = vadd.xlane.f32.xlu1 %v35_v15 }
 0x12a   :  { %v27_v16 = vpop.xlane.xlu1 %26 }
 0x12b   :  { %86 = vrcp.f32 %v27_v16 }
 0x12c   :  { %88 = vlog2.f32 %v27_v16 }
 0x12e   :  { %v41_v18 = vpop.xlane.xlu1 %40 }
 0x132   :  { %v37_v26 = vpop.xlane.xlu1 %36 }
 0x138   :  { %v87_v17 = vpop.eup %86 }
 0x139   :  { %v46_v19 = vmul.f32 %v87_v17, %v41_v18  ;;  %v89_v20 = vpop.eup %88 }
 0x13a   :  { %v43_v23 = vmul.f32 0.6931472, %v89_v20 }
 0x13b   :  { %v47_v21 = vsub.f32 1.0, %v46_v19 }
 0x13c   :  { %v44_v28 = vsub.f32 %v43_v23, %v37_v26 }
 0x13d   :  { %v48_v22 = vmax.f32 %v47_v21, 0.0 }
 0x13f   :  { %v49_v25 = vmul.f32 %v48_v22, %v48_v22 }
 0x141   :  { %v50_v27 = vmul.f32 %v49_v25, %v17_v24 }
 0x143   :  { %v51_v29 = vmul.f32 %v50_v27, %v44_v28 }
 0x145   :  { %v53_v30 = vsel %vm52_vm2, %v51_v29, 0.0 }
 0x146   :  { %54 = vadd.xlane.f32.xlu1 %v53_v30 }
 0x1cf   :  { %v55_v31 = vpop.xlane.xlu1 %54 }
 0x1d0   :  { %v56_v32 = vrot.slane %v55_v31, 4 }
 0x1d2   :  { %v57_v33 = vadd.f32 %v56_v32, %v55_v31 }
 0x1d4   :  { %v58_v34 = vrot.slane %v57_v33, 2 }
 0x1d6   :  { %v59_v35 = vadd.f32 %v58_v34, %v57_v33 }
 0x1d8   :  { %v60_v36 = vrot.slane %v59_v35, 1 }
 0x1da   :  { %v61_v37 = vadd.f32 %v60_v36, %v59_v35 }
 0x1dc   :  { %79 = vpush %v61_v37 }
 0x20d   :  { %s80_s18 = spop %79 }
 0x20e   :  { %v63_v38 = vstv %s80_s18 }
 0x20f   :  { %64 = vst [vmem:[#allocation2] sm:$0xff] %v63_v38 }
 0x210   :  { %101 = shalt.err (!%p98_p4)
}
 0x211   :  { %74 = dma.vmem_to_hbm [thread:$0]  %s72_s17, 128, %s153_s3, [#allocation3]  }
 0x212   :  { %110 = dma.done.wait [#allocation3], 128  }
 0x213   :  { %111 = vsyncadd [#allocation3], 4294967168 }
 0x214   :  { %78 = vsyncpa [#allocation3], 1 }

</bundles_post_ra>
